<compile_context>
chip_gen: v7x
topology: tpu7x:2x2x1
jax: 0.10.0
libtpu: 0.0.40
codegen_flags: <defaults>
</compile_context>

<pallas_src>
import functools

import jax
import jax.numpy as jnp
from jax.experimental import pallas as pl
from jax.experimental.pallas import tpu as pltpu

_MIB = 1024 * 1024


def _round_up(n, m):
    return ((n + m - 1) // m) * m


# ---------------------------------------------------------------------------
# Device introspection (cached, with conservative fallbacks).
# ---------------------------------------------------------------------------

@functools.lru_cache(maxsize=1)
def _device_kind():
    try:
        return jax.devices()[0].device_kind.lower()
    except Exception:
        return ""


@functools.lru_cache(maxsize=1)
def _vmem_capacity_bytes():
    try:
        return int(pltpu.get_tpu_info().vmem_capacity_bytes)
    except Exception:
        kind = _device_kind()
        if "v7" in kind or "tpu7" in kind:
            return 64 * _MIB
        return 128 * _MIB


@functools.lru_cache(maxsize=1)
def _mxu_align():
    # v6e / v7x MXU passes are 256x256; v5e is 4x(128x128).
    return 128 if "v5" in _device_kind() else 256


@functools.lru_cache(maxsize=1)
def _single_buffer_supported():
    """Probe whether BlockSpec(..., pipeline_mode=pl.Buffered(1)) lowers/runs."""
    if not hasattr(pl, "Buffered"):
        return False

    def _copy(x_ref, o_ref):
        o_ref[...] = x_ref[...]

    try:
        x = jnp.zeros((8, 128), jnp.float32)
        out = pl.pallas_call(
            _copy,
            out_shape=jax.ShapeDtypeStruct((16, 128), jnp.float32),
            grid=(2,),
            in_specs=[pl.BlockSpec((8, 128), lambda i: (0, 0),
                                   pipeline_mode=pl.Buffered(1))],
            out_specs=pl.BlockSpec((8, 128), lambda i: (i, 0)),
        )(x)
        jax.block_until_ready(out)
        return True
    except Exception:
        return False


def _pick_h_tile(hp, target):
    """Largest multiple of 128 that divides hp and is <= max(128, target)."""
    m = hp // 128
    g_max = max(1, min(m, max(128, int(target)) // 128))
    for g in range(g_max, 0, -1):
        if m % g == 0:
            return 128 * g
    return 128


# ---------------------------------------------------------------------------
# Kernels.
# ---------------------------------------------------------------------------

def _mlp_kernel(x_ref, w1_ref, b1_ref, w2_ref, b2_ref, o_ref):
    """Weight-resident path: single grid axis over batch tiles."""
    # fc1 on the MXU: bf16 operands, f32 accumulation.
    h = jnp.dot(x_ref[...], w1_ref[...], preferred_element_type=jnp.float32)
    # bias + ReLU epilogue stays in f32 on the VPU.
    h = jnp.maximum(h + b1_ref[...], 0.0)
    # fc2: cast the activation tile back to bf16 for the MXU, f32 accumulation.
    out = jnp.dot(h.astype(jnp.bfloat16), w2_ref[...],
                  preferred_element_type=jnp.float32)
    o_ref[...] = (out + b2_ref[...]).astype(o_ref.dtype)


def _mlp_kernel_htiled(x_ref, w1_ref, b1_ref, w2_ref, b2_ref, o_ref, acc_ref):
    """Hidden-dim tiled path: grid = (batch tiles, H tiles), f32 accumulator."""
    k = pl.program_id(1)

    @pl.when(k == 0)
    def _():
        acc_ref[...] = jnp.zeros_like(acc_ref)

    h = jnp.dot(x_ref[...], w1_ref[...], preferred_element_type=jnp.float32)
    h = jnp.maximum(h + b1_ref[...], 0.0)
    acc_ref[...] += jnp.dot(h.astype(jnp.bfloat16), w2_ref[...],
                            preferred_element_type=jnp.float32)

    @pl.when(k == pl.num_programs(1) - 1)
    def _():
        o_ref[...] = (acc_ref[...] + b2_ref[...]).astype(o_ref.dtype)


# ---------------------------------------------------------------------------
# Parameter preparation (hoisted out of the per-call hot path).
# ---------------------------------------------------------------------------

def init_params(key, input_size, hidden_size, output_size):
    """nn.Linear-style uniform(-1/sqrt(fan_in), 1/sqrt(fan_in)) init.

    PyTorch stores Linear weights as [out, in]; we keep the transpose
    [in, out] so the kernel matmuls directly.
    """
    k1, k2, k3, k4 = jax.random.split(key, 4)
    bound1 = 1.0 / jnp.sqrt(input_size)
    bound2 = 1.0 / jnp.sqrt(hidden_size)
    w1 = jax.random.uniform(k1, (input_size, hidden_size), jnp.float32, -bound1, bound1)
    b1 = jax.random.uniform(k2, (1, hidden_size), jnp.float32, -bound1, bound1)
    w2 = jax.random.uniform(k3, (hidden_size, output_size), jnp.float32, -bound2, bound2)
    b2 = jax.random.uniform(k4, (1, output_size), jnp.float32, -bound2, bound2)
    return w1, b1, w2, b2


def prepare_params(w1, b1, w2, b2, *, align=None):
    """Pad (MXU-aligned) + cast the parameters once; returns (arrays, dims)."""
    if align is None:
        align = _mxu_align()
    I, H = w1.shape
    O = w2.shape[1]
    Ip, Hp, Op = (_round_up(d, align) for d in (I, H, O))
    b1 = jnp.reshape(b1, (1, H))
    b2 = jnp.reshape(b2, (1, O))
    w1p = jnp.pad(w1, ((0, Ip - I), (0, Hp - H))).astype(jnp.bfloat16)
    w2p = jnp.pad(w2, ((0, Hp - H), (0, Op - O))).astype(jnp.bfloat16)
    b1p = jnp.pad(b1, ((0, 0), (0, Hp - H))).astype(jnp.float32)
    b2p = jnp.pad(b2, ((0, 0), (0, Op - O))).astype(jnp.float32)
    return (w1p, b1p, w2p, b2p), (I, H, O)


# ---------------------------------------------------------------------------
# pallas_call wrapper.
# ---------------------------------------------------------------------------

@functools.partial(
    jax.jit,
    static_argnames=("rows", "cols", "tm", "tk", "htiled", "out_dtype",
                     "single_buffer", "vmem_limit"))
def _mlp_impl(x, w1p, b1p, w2p, b2p, *, rows, cols, tm, tk, htiled, out_dtype,
              single_buffer, vmem_limit):
    B, I = x.shape
    Ip, Hp = w1p.shape
    Op = w2p.shape[1]
    Bp = _round_up(B, tm)

    # PyTorch's x.float() + Linear is realized as bf16 MXU operands with f32
    # accumulation; one fused pad+cast for the activations.
    xp = jnp.pad(x, ((0, Bp - B), (0, Ip - I))).astype(jnp.bfloat16)

    def _spec(shape, index_map, *, resident=False):
        # Grid-invariant operands: single-buffer (double-buffering a constant
        # index_map is pure VMEM waste) when the runtime supports it.
        if resident and single_buffer:
            return pl.BlockSpec(shape, index_map, pipeline_mode=pl.Buffered(1))
        return pl.BlockSpec(shape, index_map)

    compiler_params_kw = dict(vmem_limit_bytes=vmem_limit)

    if not htiled:
        # Weight-resident: weights/biases stay in VMEM across the whole batch
        # grid; x / out tiles stream (software pipelined).
        out = pl.pallas_call(
            _mlp_kernel,
            out_shape=jax.ShapeDtypeStruct((Bp, Op), out_dtype),
            grid=(Bp // tm,),
            in_specs=[
                pl.BlockSpec((tm, Ip), lambda i: (i, 0)),          # x (streams)
                _spec((Ip, Hp), lambda i: (0, 0), resident=True),  # W1
                _spec((1, Hp), lambda i: (0, 0), resident=True),   # b1
                _spec((Hp, Op), lambda i: (0, 0), resident=True),  # W2
                _spec((1, Op), lambda i: (0, 0), resident=True),   # b2
            ],
            out_specs=pl.BlockSpec((tm, Op), lambda i: (i, 0)),
            compiler_params=pltpu.CompilerParams(
                dimension_semantics=("parallel",), **compiler_params_kw),
        )(xp, w1p, b1p, w2p, b2p)
    else:
        # Hidden-dim tiled: W1/W2/b1 stream over H tiles; an f32 accumulator
        # scratch carries the fc2 partial sums (pl.when init / finalize).
        out = pl.pallas_call(
            _mlp_kernel_htiled,
            out_shape=jax.ShapeDtypeStruct((Bp, Op), out_dtype),
            grid=(Bp // tm, Hp // tk),
            in_specs=[
                pl.BlockSpec((tm, Ip), lambda i, k: (i, 0)),          # x
                pl.BlockSpec((Ip, tk), lambda i, k: (0, k)),          # W1 H-tile
                pl.BlockSpec((1, tk), lambda i, k: (0, k)),           # b1 H-tile
                pl.BlockSpec((tk, Op), lambda i, k: (k, 0)),          # W2 H-tile
                _spec((1, Op), lambda i, k: (0, 0), resident=True),   # b2
            ],
            out_specs=pl.BlockSpec((tm, Op), lambda i, k: (i, 0)),
            scratch_shapes=[pltpu.VMEM((tm, Op), jnp.float32)],
            compiler_params=pltpu.CompilerParams(
                dimension_semantics=("parallel", "arbitrary"),
                **compiler_params_kw),
        )(xp, w1p, b1p, w2p, b2p)

    return out[:rows, :cols]


def mlp_pallas(x, params, *, tm=None, out_dtype=jnp.float32,
               hidden_tiling=None, h_tile=None):
    """MLP forward.  `params` comes from prepare_params().  Returns [B, O]."""
    (w1p, b1p, w2p, b2p), (I, H, O) = params
    B = x.shape[0]
    assert x.shape[1] == I, "input feature dim mismatch"

    Ip, Hp = w1p.shape
    Op = w2p.shape[1]

    vmem_cap = _vmem_capacity_bytes()
    cap = (vmem_cap * 4) // 5             # ~100 MiB on v5e/v6e, ~51 MiB on v7x
    single_buffer = _single_buffer_supported()
    w_buf = 1 if single_buffer else 2
    out_bytes = jnp.finfo(out_dtype).bits // 8

    # Batch tile: multiple of 16 (bf16 sublane packing).  Default 512 on
    # 128-MiB-VMEM parts (v5e/v6e), 256 on v7x.  Keep >= ~4 grid steps when the
    # batch is large enough so both v7x TensorCores get work and the x/out
    # DMAs software-pipeline.
    if tm is None:
        tm = 512 if vmem_cap > 96 * _MIB else 256
    TM = max(16, min(_round_up(tm, 16), _round_up(B, 16)))
    if B >= 64:
        TM = min(TM, max(16, _round_up(pl.cdiv(B, 4), 16)))
    Bp = _round_up(B, TM)

    # Weight residency check -> hidden-dim tiling when the padded weights are
    # too large to hold in VMEM (most relevant for v7x's 64 MiB per TC).
    w_bytes = (Ip * Hp + Hp * Op) * 2 * w_buf + (Hp + Op) * 4 * w_buf
    if hidden_tiling is None:
        hidden_tiling = w_bytes > cap // 2
    if h_tile is not None:
        hidden_tiling = True
        assert h_tile % 128 == 0 and Hp % h_tile == 0, "h_tile must divide Hp"
        TK = int(h_tile)
    elif hidden_tiling:
        # Streamed (double-buffered) weight tiles should use <= ~1/3 of budget.
        tk_target = (cap // 3) // max(1, 4 * (Ip + Op))
        TK = _pick_h_tile(Hp, tk_target)
    else:
        TK = Hp

    # VMEM requirement.  No double hedging: the estimate already accounts for
    # each operand's buffer multiplicity.
    if hidden_tiling:
        est = (2 * TM * Ip * 2 + 2 * TM * Op * out_bytes        # x / out tiles
               + 2 * (Ip * TK + TK * Op) * 2 + 2 * (TK + Op) * 4  # streamed W/b
               + TM * Op * 4                                    # accumulator
               + TM * TK * 4 + TM * Op * 4)                     # intermediates
    else:
        est = (2 * TM * Ip * 2 + 2 * TM * Op * out_bytes
               + w_bytes
               + TM * Hp * 4 + TM * Op * 4)
    vmem_limit = int(min(cap, max(16 * _MIB, est + 2 * _MIB)))

    return _mlp_impl(x, w1p, b1p, w2p, b2p,
                     rows=B, cols=O, tm=int(TM), tk=int(TK),
                     htiled=bool(hidden_tiling), out_dtype=out_dtype,
                     single_buffer=bool(single_buffer), vmem_limit=vmem_limit)


if __name__ == "__main__":
    batch = 8
    input_size = 32
    hidden_size = 64
    output_size = 16

    key = jax.random.PRNGKey(0)
    kx, kp = jax.random.split(key)
    x = jax.random.normal(kx, (batch, input_size), dtype=jnp.float32)
    w1, b1, w2, b2 = init_params(kp, input_size, hidden_size, output_size)
    params = prepare_params(w1, b1, w2, b2)

    # Default weight-resident path.
    out = mlp_pallas(x, params)
    jax.block_until_ready(out)
    assert out.shape == (batch, output_size) and out.dtype == jnp.float32

    # Hidden-dim tiled (accumulator) path, forced so it is exercised even at
    # small widths (this is the path large-H/O configs take automatically).
    out_tiled = mlp_pallas(x, params, hidden_tiling=True, h_tile=128)
    jax.block_until_ready(out_tiled)

    # Optional bf16 output (halves writeback bytes / out-tile VMEM).
    out_bf16 = mlp_pallas(x, params, out_dtype=jnp.bfloat16)
    jax.block_until_ready(out_bf16)

    # Reference computed the same way the kernel does (bf16 operands, f32
    # accumulation) -> tight tolerance.
    xb, w1b, w2b = (t.astype(jnp.bfloat16) for t in (x, w1, w2))
    h_ref = jnp.maximum(jnp.dot(xb, w1b, preferred_element_type=jnp.float32) + b1, 0.0)
    ref_bf16 = jnp.dot(h_ref.astype(jnp.bfloat16), w2b,
                       preferred_element_type=jnp.float32) + b2
    assert jnp.allclose(out, ref_bf16, atol=1e-3, rtol=1e-3)
    assert jnp.allclose(out_tiled, ref_bf16, atol=1e-3, rtol=1e-3)
    assert jnp.allclose(out_bf16.astype(jnp.float32), ref_bf16, atol=3e-2, rtol=3e-2)

    # Loose sanity check against the strict f32 forward of the PyTorch module.
    ref_f32 = jnp.maximum(x @ w1 + b1, 0.0) @ w2 + b2
    assert jnp.allclose(out, ref_f32, atol=5e-2, rtol=5e-2)

    print("KERNEL_OK")
</pallas_src>

<mosaic_0001>
module attributes {stable_mosaic.version = 11 : i64} {
  func.func @_copy(%arg0: i32, %arg1: memref<8x128xf32, #tpu.memory_space<vmem>>, %arg2: memref<8x128xf32, #tpu.memory_space<vmem>>) attributes {dimension_semantics = [#tpu.dimension_semantics<arbitrary>], iteration_bounds = array<i64: 2>, scalar_prefetch = 0 : i64, scratch_operands = 0 : i64, tpu.core_type = #tpu.core_type<tc>, window_params = [{pipeline_mode = #tpu.pipeline_mode<synchronous>, transform_indices = @transform_0, window_bounds = array<i64: 8, 128>}, {transform_indices = @transform_1, window_bounds = array<i64: 8, 128>}]} {
    %c0 = arith.constant 0 : index
    %c0_0 = arith.constant 0 : index
    %0 = vector.load %arg1[%c0, %c0_0] : memref<8x128xf32, #tpu.memory_space<vmem>>, vector<8x128xf32>
    %c0_1 = arith.constant 0 : index
    %c0_2 = arith.constant 0 : index
    %1 = vector.load %arg2[%c0_1, %c0_2] : memref<8x128xf32, #tpu.memory_space<vmem>>, vector<8x128xf32>
    tpu.vector_store %arg2[%c0_1, %c0_2], %0 {strides = array<i32>} : memref<8x128xf32, #tpu.memory_space<vmem>>, vector<8x128xf32>,
    return
  }
  func.func @transform_0(%arg0: i32) -> (i32, i32) {
    %c0_i32 = arith.constant 0 : i32
    %c0_i32_0 = arith.constant 0 : i32
    %c0_i32_1 = arith.constant 0 : i32
    return %c0_i32, %c0_i32_0 : i32, i32
  }
  func.func @transform_1(%arg0: i32) -> (i32, i32) {
    %c0_i32 = arith.constant 0 : i32
    %c0_i32_0 = arith.constant 0 : i32
    return %arg0, %c0_i32 : i32, i32
  }
}

module attributes {stable_mosaic.version = 11 : i64} {
  func.func @_mlp_kernel(%arg0: i32, %arg1: memref<16x256xbf16, #tpu.memory_space<vmem>>, %arg2: memref<256x256xbf16, #tpu.memory_space<vmem>>, %arg3: memref<1x256xf32, #tpu.memory_space<vmem>>, %arg4: memref<256x256xbf16, #tpu.memory_space<vmem>>, %arg5: memref<1x256xf32, #tpu.memory_space<vmem>>, %arg6: memref<16x256xf32, #tpu.memory_space<vmem>>) attributes {dimension_semantics = [#tpu.dimension_semantics<parallel>], iteration_bounds = array<i64: 1>, scalar_prefetch = 0 : i64, scratch_operands = 0 : i64, tpu.core_type = #tpu.core_type<tc>, window_params = [{transform_indices = @transform_0, window_bounds = array<i64: 16, 256>}, {pipeline_mode = #tpu.pipeline_mode<synchronous>, transform_indices = @transform_1, window_bounds = array<i64: 256, 256>}, {pipeline_mode = #tpu.pipeline_mode<synchronous>, transform_indices = @transform_2, window_bounds = array<i64: 1, 256>}, {pipeline_mode = #tpu.pipeline_mode<synchronous>, transform_indices = @transform_3, window_bounds = array<i64: 256, 256>}, {pipeline_mode = #tpu.pipeline_mode<synchronous>, transform_indices = @transform_4, window_bounds = array<i64: 1, 256>}, {transform_indices = @transform_5, window_bounds = array<i64: 16, 256>}]} {
    %c0 = arith.constant 0 : index
    %c0_0 = arith.constant 0 : index
    %0 = vector.load %arg1[%c0, %c0_0] : memref<16x256xbf16, #tpu.memory_space<vmem>>, vector<16x256xbf16>
    %c0_1 = arith.constant 0 : index
    %c0_2 = arith.constant 0 : index
    %1 = vector.load %arg2[%c0_1, %c0_2] : memref<256x256xbf16, #tpu.memory_space<vmem>>, vector<256x256xbf16>
    %cst = arith.constant dense<0.000000e+00> : vector<16x256xf32>
    %2 = tpu.matmul %0, %1, %cst {dimension_numbers = #tpu.dot_dimension_numbers<[1], [0], [0], [1], [0, 0, 1, 1], [], []>} : vector<16x256xbf16>, vector<256x256xbf16>, vector<16x256xf32> -> vector<16x256xf32>
    %c0_3 = arith.constant 0 : index
    %c0_4 = arith.constant 0 : index
    %3 = vector.load %arg3[%c0_3, %c0_4] : memref<1x256xf32, #tpu.memory_space<vmem>>, vector<1x256xf32>
    %4 = vector.broadcast %3 : vector<1x256xf32> to vector<16x256xf32>
    %5 = arith.addf %2, %4 : vector<16x256xf32>
    %cst_5 = arith.constant 0.000000e+00 : f32
    %6 = vector.broadcast %cst_5 : f32 to vector<16x256xf32>
    %7 = arith.maximumf %5, %6 : vector<16x256xf32>
    %8 = arith.truncf %7 : vector<16x256xf32> to vector<16x256xbf16>
    %c0_6 = arith.constant 0 : index
    %c0_7 = arith.constant 0 : index
    %9 = vector.load %arg4[%c0_6, %c0_7] : memref<256x256xbf16, #tpu.memory_space<vmem>>, vector<256x256xbf16>
    %cst_8 = arith.constant dense<0.000000e+00> : vector<16x256xf32>
    %10 = tpu.matmul %8, %9, %cst_8 {dimension_numbers = #tpu.dot_dimension_numbers<[1], [0], [0], [1], [0, 0, 1, 1], [], []>} : vector<16x256xbf16>, vector<256x256xbf16>, vector<16x256xf32> -> vector<16x256xf32>
    %c0_9 = arith.constant 0 : index
    %c0_10 = arith.constant 0 : index
    %11 = vector.load %arg5[%c0_9, %c0_10] : memref<1x256xf32, #tpu.memory_space<vmem>>, vector<1x256xf32>
    %12 = vector.broadcast %11 : vector<1x256xf32> to vector<16x256xf32>
    %13 = arith.addf %10, %12 : vector<16x256xf32>
    %c0_11 = arith.constant 0 : index
    %c0_12 = arith.constant 0 : index
    %14 = vector.load %arg6[%c0_11, %c0_12] : memref<16x256xf32, #tpu.memory_space<vmem>>, vector<16x256xf32>
    tpu.vector_store %arg6[%c0_11, %c0_12], %13 {strides = array<i32>} : memref<16x256xf32, #tpu.memory_space<vmem>>, vector<16x256xf32>,
    return
  }
  func.func @transform_0(%arg0: i32) -> (i32, i32) {
    %c0_i32 = arith.constant 0 : i32
    %c0_i32_0 = arith.constant 0 : i32
    return %arg0, %c0_i32 : i32, i32
  }
  func.func @transform_1(%arg0: i32) -> (i32, i32) {
    %c0_i32 = arith.constant 0 : i32
    %c0_i32_0 = arith.constant 0 : i32
    %c0_i32_1 = arith.constant 0 : i32
    return %c0_i32, %c0_i32_0 : i32, i32
  }
  func.func @transform_2(%arg0: i32) -> (i32, i32) {
    %c0_i32 = arith.constant 0 : i32
    %c0_i32_0 = arith.constant 0 : i32
    %c0_i32_1 = arith.constant 0 : i32
    return %c0_i32, %c0_i32_0 : i32, i32
  }
  func.func @transform_3(%arg0: i32) -> (i32, i32) {
    %c0_i32 = arith.constant 0 : i32
    %c0_i32_0 = arith.constant 0 : i32
    %c0_i32_1 = arith.constant 0 : i32
    return %c0_i32, %c0_i32_0 : i32, i32
  }
  func.func @transform_4(%arg0: i32) -> (i32, i32) {
    %c0_i32 = arith.constant 0 : i32
    %c0_i32_0 = arith.constant 0 : i32
    %c0_i32_1 = arith.constant 0 : i32
    return %c0_i32, %c0_i32_0 : i32, i32
  }
  func.func @transform_5(%arg0: i32) -> (i32, i32) {
    %c0_i32 = arith.constant 0 : i32
    %c0_i32_0 = arith.constant 0 : i32
    return %arg0, %c0_i32 : i32, i32
  }
}

</mosaic_0001>

<bundles_post_ra>
// kernel: tpu_custom_call.1
= control target key start
LH: loop header
LB: loop body
LE: loop exit
PB: predicated region body
PF: predicated region fallthrough
CT: control target
= control target key end

     0   :  { %6 = vsyncpa [#allocation3], 0  ;;  %s481_s0 = inlined_call_operand.hbm [shape: f32[8,128], index: 0, kind: input, shape index: {}]   ;;  %s482_s1 = inlined_call_operand.hbm [shape: f32[16,128], index: 1, kind: output, shape index: {}]  }
   0x1   :  { %7 = vsyncpa [#allocation4], 0 }
   0x2   :  { %9 = vsyncpa [#allocation4 + $0x1], 0  ;;  %s351_s6 = smov 0   ;;  %s353_s7 = smov 0  }
   0x3   :  { %s355_s8 = smov 0   ;;  %s357_s9 = smov 0  }
   0x4 LB: > { %s372_s10 = sadd.s32 4294967295, %s337_s9   ;;  %s183_s11 = sadd.s32 4294967294, %s337_s9   ;;  %s337_s9 = sphi %s357_s9, %s498_s9   ;;  %s333_s8 = sphi %s355_s8, %s497_s8   ;;  %s329_s7 = sphi %s353_s7, %s496_s7   ;;  %s325_s6 = sphi %s351_s6, %s495_s6  }
   0x5   : > { %s376_s12 = sadd.s32 1, %s337_s9   ;;  %s43_s13 = sadd.s32 1, %s333_s8 }
   0x6   : > { %s40_s14 = ssub.s32 %s337_s9, %s376_s12  ;;  %p53_p0 = scmp.ne.s32.totalorder %s333_s8, %s329_s7 }
   0x7   : > { %p41_p1 = scmp.eq.s32.totalorder %s40_s14, 0  ;;  %p54_p2 = scmp.eq.s32.totalorder %s372_s10, 1 }
   0x8   : > { %p59_p3 = scmp.ne.s32.totalorder %s329_s7, %s325_s6  ;;  %p60_p4 = scmp.eq.s32.totalorder %s183_s11, 1 }
   0x9   : > { %s387_s15 = scalar_select %p41_p1, %s333_s8, %s43_s13  }
   0xa   : > { %p389_p5 = por %p54_p2, %p53_p0  ;;  %p393_p6 = por %p60_p4, %p59_p3 }
   0xb   : > { %p184_p7 = scmp.ge.s32.totalorder %s337_s9, 1  ;;  %p67_p8 = scmp.lt.s32.totalorder %s337_s9, 3 }
   0xc   : > { %s486_s16 = scalar_select %p389_p5, 1, 0 }
   0xd   : > { %s487_s17 = scalar_select %p393_p6, 1, 0 }
   0xe   : > { %p483_p9 = scmp.eq.s32.totalorder %s372_s10, 0  ;;  %p400_p10 = pnand %p184_p7, %p67_p8 }
   0xf   : > { %s339_s19 = smov [#allocation2]   ;;  %s243_s24 = scalar_lea.hbm %s481_s0, 128 }
  0x10   : > { %s488_s18 = scalar_select %p400_p10, 1, 0 }
  0x11   : > { %s80_s20 = sshll.u32 %s339_s19, 4  ;;  %p199_p11 = pneg %p400_p10  ;;  %s81_s20 = int_to_ptr.vmem [resolvable:$true] %s80_s20 }
  0x12   : > { %p244_p13 = scmp.ne.s32.totalorder %s481_s0, %s243_s24  ;;  %p250_p3 = scmp.lt.u32.totalorder %s243_s24, %s481_s0 }
  0x13   : > { %p408_p12 = pnand %p483_p9, %p199_p11 }
  0x15   : > { %p245_p0 = pneg %p408_p12 }
  0x17   : > { %p246_p1 = pnand %p245_p0, %p244_p13 }
  0x19   : > { %p247_p2 = pneg %p246_p1 }
  0x1b   : > { %p252_p4 = pnand %p250_p3, %p247_p2 }
  0x1d   : > { %255 = shalt.err (!%p252_p4)
}
  0x1e   : > { %s256_s29 = scalar_lea.vmem %s81_s20, 128  ;;  %p264_p9 = scmp.lt.s32.totalorder %s81_s20, %s81_s20 }
  0x1f   : > { %p257_p7 = scmp.ne.s32.totalorder %s81_s20, %s256_s29  ;;  %p265_p6 = scmp.lt.s32.totalorder %s256_s29, %s256_s29 }
  0x21   : > { %p259_p8 = pnand %p257_p7, %p245_p0  ;;  %p266_p5 = por %p265_p6, %p264_p9 }
  0x23   : > { %p260_p11 = pneg %p259_p8 }
  0x25   : > { %p267_p10 = pnand %p266_p5, %p260_p11 }
  0x27   : > { %270 = shalt.err (!%p267_p10)
}
  0x28   : > { %202 = dma.hbm_to_vmem [thread:$0]  (!%p408_p12), %s481_s0, 128, %s81_s20, [#allocation3]  }
  0x29   : > { %p490_p13 = scmp.ne.s32.totalorder %s488_s18, 0 }
  0x2a   : > { %p491_p1 = scmp.eq.s32.totalorder (!%p490_p13), %s372_s10, 0 }
  0x2b   : > { %93 = sbr.rel (%p490_p13) target bundleno = 77 (0x4d), region = 24 }
  0x32   : > { %316 = dma.done.wait (%p491_p1), [#allocation3], 128   ;;  %p492_p0 = pmov %p491_p1 }
  0x33   : > { %s105_s3 = sand.u32 1, %s329_s7   ;;  %s190_s13 = sshll.u32 %s372_s10, 7  ;;  %v108_v0 = vld [vmem:[#allocation2] sm:$0xff] }
  0x34   : > { %318 = vsyncadd (%p492_p0), [#allocation3], 4294967168  ;;  %s188_s4 = sshll.u32 %s105_s3, 3  ;;  %s441_s18 = scalar_lea.hbm %s482_s1, %s190_s13 }
  0x35   : > { %s107_s5 = scalar_lea.vmem [#allocation5], %s188_s4  ;;  %s111_s20 = scalar_lea.sflag [#allocation4], %s105_s3 }
  0x36   : > { %s124_s11 = sshll.u32 %s107_s5, 4  ;;  %109 = vst [vmem:[%s107_s5] sm:$0xff] %v108_v0  ;;  %p493_p6 = scmp.ne.s32.totalorder %s486_s16, 0  ;;  %s436_s11 = int_to_ptr.vmem [resolvable:$true] %s124_s11 }
  0x37   : > { %s271_s21 = scalar_lea.vmem %s436_s11, 128  ;;  %s340_s22 = smov [#allocation5]  }
  0x38   : > { %p272_p5 = scmp.ne.s32.totalorder %s436_s11, %s271_s21  ;;  %s275_s10 = sshll.u32 %s340_s22, 4  ;;  %s276_s10 = int_to_ptr.vmem [resolvable:$false] %s275_s10 }
  0x39   : > { %s277_s23 = scalar_lea.vmem %s276_s10, 256  ;;  %p278_p12 = scmp.lt.s32.totalorder %s436_s11, %s276_s10 }
  0x3a   : > { %p273_p9 = pnand %p272_p5, %p493_p6  ;;  %p279_p2 = scmp.lt.s32.totalorder %s277_s23, %s271_s21 }
  0x3c   : > { %p274_p10 = pneg %p273_p9  ;;  %p280_p3 = por %p279_p2, %p278_p12 }
  0x3e   : > { %p281_p4 = pnand %p280_p3, %p274_p10 }
  0x40   : > { %284 = shalt.err (!%p281_p4)
}
  0x41   : > { %s285_s24 = scalar_lea.hbm %s441_s18, 128  ;;  %s289_s27 = scalar_lea.hbm %s482_s1, 256 }
  0x42   : > { %p286_p7 = scmp.ne.s32.totalorder %s441_s18, %s285_s24  ;;  %p290_p13 = scmp.lt.u32.totalorder %s441_s18, %s482_s1 }
  0x43   : > { %p291_p1 = scmp.lt.u32.totalorder %s289_s27, %s285_s24  ;;  %p293_p5 = scmp.lt.u32.totalorder %s285_s24, %s441_s18 }
  0x44   : > { %p287_p8 = pnand %p286_p7, %p493_p6 }
  0x45   : > { %p292_p0 = por %p291_p1, %p290_p13 }
  0x46   : > { %p288_p11 = pneg %p287_p8 }
  0x47   : > { %p294_p9 = por %p293_p5, %p292_p0 }
  0x49   : > { %p295_p10 = pnand %p294_p9, %p288_p11 }
  0x4b   : > { %298 = shalt.err (!%p295_p10)
}
  0x4c   : > { %197 = dma.vmem_to_hbm [thread:$0]  (%p493_p6), %s436_s11, 128, %s441_s18, %s111_s20  }
  0x4d PF: > { %p209_p12 = scmp.ge.s32.totalorder %s337_s9, 2  ;;  %s136_s30 = sand.u32 1, %s325_s6  }
  0x4e   : > { %p494_p2 = scmp.ne.s32.totalorder %s487_s17, 0  ;;  %s137_s2 = scalar_lea.sflag [#allocation4], %s136_s30 }
  0x50   : > { %p204_p3 = pnand %p209_p12, %p494_p2 }
  0x52   : > { %320 = dma.done.wait (!%p204_p3), %s137_s2, 128  }
  0x53   : > { %322 = vsyncadd (!%p204_p3), %s137_s2, 4294967168  ;;  %p12_p4 = scmp.ge.s32.totalorder %s376_s12, 4   ;;  %s495_s6 = smov %s329_s7 }
  0x54   : > { %s496_s7 = smov %s333_s8  ;;  %s497_s8 = smov %s387_s15 }
  0x55   : > { %s498_s9 = smov %s376_s12  ;;  %14 = sbr.rel (!%p12_p4) target bundleno = 4 (0x4), region = 61 }
  0x5c   :  { %142 = vsyncpa [#allocation3], 1 }
  0x5d   :  { %144 = vsyncpa [#allocation3 + $0x1], 1 }
  0x5e   :  { %145 = vsyncpa [#allocation4], 1 }
  0x5f   :  { %147 = vsyncpa [#allocation4 + $0x1], 1 }

// kernel: _mlp_impl.1
= control target key start
LH: loop header
LB: loop body
LE: loop exit
PB: predicated region body
PF: predicated region fallthrough
CT: control target
= control target key end

     0   :  { %10 = vsyncpa [#allocation3], 0  ;;  %s869_s0 = inlined_call_operand.vmem [shape: bf16[16,256], index: 0, kind: input, shape index: {}]   ;;  %s870_s1 = inlined_call_operand.hbm [shape: bf16[256,256], index: 1, kind: input, shape index: {}]   ;;  %s871_s2 = inlined_call_operand.vmem [shape: f32[1,256], index: 2, kind: input, shape index: {}]   ;;  %s872_s3 = inlined_call_operand.hbm [shape: bf16[256,256], index: 3, kind: input, shape index: {}]   ;;  %s873_s4 = inlined_call_operand.vmem [shape: f32[1,256], index: 4, kind: input, shape index: {}]   ;;  %s874_s5 = inlined_call_operand.vmem [shape: f32[16,256], index: 5, kind: output, shape index: {}]  }
   0x1   :  { %11 = vsyncpa [#allocation5], 0  ;;  %s787_s18 = smov [#allocation2]   ;;  %s739_s22 = scalar_lea.hbm %s870_s1, 4096 }
   0x2   :  { %s19_s19 = sshll.u32 %s787_s18, 4  ;;  %p740_p0 = scmp.ne.s32.totalorder %s870_s1, %s739_s22  ;;  %s20_s19 = int_to_ptr.vmem [resolvable:$true] %s19_s19 }
   0x3   :  { %p743_p1 = scmp.lt.u32.totalorder %s739_s22, %s870_s1 }
   0x5   :  { %p745_p2 = pnand %p743_p1, %p740_p0 }
   0x7   :  { %748 = shalt.err (!%p745_p2)
}
   0x8   :  { %s749_s27 = scalar_lea.vmem %s20_s19, 4096  ;;  %p754_p4 = scmp.lt.s32.totalorder %s20_s19, %s20_s19 }
   0x9   :  { %p750_p3 = scmp.ne.s32.totalorder %s20_s19, %s749_s27  ;;  %p755_p5 = scmp.lt.s32.totalorder %s749_s27, %s749_s27 }
   0xb   :  { %p756_p6 = por %p755_p5, %p754_p4 }
   0xd   :  { %p757_p7 = pnand %p756_p6, %p750_p3 }
   0xf   :  { %760 = shalt.err (!%p757_p7)
}
  0x10   :  { %s788_s28 = smov 128   ;;  %s789_s29 = smov 8  }
  0x11   :  { %25 = dma.hbm_to_vmem [thread:$0]  %s870_s1, 4096, %s20_s19, [#allocation3], %s788_s28, %s788_s28, %s789_s29  }
  0x12   :  { %s790_s7 = smov [#allocation4]   ;;  %s761_s11 = scalar_lea.hbm %s872_s3, 4096 }
  0x13   :  { %s33_s8 = sshll.u32 %s790_s7, 4  ;;  %p762_p8 = scmp.ne.s32.totalorder %s872_s3, %s761_s11  ;;  %s34_s8 = int_to_ptr.vmem [resolvable:$true] %s33_s8 }
  0x14   :  { %p765_p9 = scmp.lt.u32.totalorder %s761_s11, %s872_s3 }
  0x16   :  { %p767_p10 = pnand %p765_p9, %p762_p8 }
  0x18   :  { %770 = shalt.err (!%p767_p10)
}
  0x19   :  { %s771_s16 = scalar_lea.vmem %s34_s8, 4096  ;;  %p776_p12 = scmp.lt.s32.totalorder %s34_s8, %s34_s8 }
  0x1a   :  { %p772_p11 = scmp.ne.s32.totalorder %s34_s8, %s771_s16  ;;  %p777_p13 = scmp.lt.s32.totalorder %s771_s16, %s771_s16 }
  0x1c   :  { %p778_p0 = por %p777_p13, %p776_p12 }
  0x1e   :  { %p779_p1 = pnand %p778_p0, %p772_p11 }
  0x20   :  { %782 = shalt.err (!%p779_p1)
}
  0x21   :  { %39 = dma.hbm_to_vmem [thread:$0]  %s872_s3, 4096, %s34_s8, [#allocation5], %s788_s28, %s788_s28, %s789_s29  }
  0x22   :  { %783 = dma.done.wait [#allocation3], 4096  }
  0x23   :  { %784 = vsyncadd [#allocation3], 4294963200 }
  0x24   :  { %785 = dma.done.wait [#allocation5], 4096  }
  0x25   :  { %786 = vsyncadd [#allocation5], 4294963200  ;;  %v640_v0 = vld [vmem:[#allocation2 + $0x4] ss:$8 sps:$4 sm:$0xff]   ;;  %v642_v1 = vld [vmem:[#allocation2] ss:$8 sps:$4 sm:$0xff]  }
  0x26   :  { %264 = vmatprep.subr.bf16.mxu0 %v640_v0  ;;  %v643_v2 = vld [vmem:[#allocation2 + $0x14] ss:$8 sps:$4 sm:$0xff]   ;;  %v645_v3 = vld [vmem:[#allocation2 + $0x10] ss:$8 sps:$4 sm:$0xff]   ;;  %v646_v4 = vld [vmem:[#allocation2 + $0x24] ss:$8 sps:$4 sm:$0xff]  }
  0x27   :  { %265 = vmatpush1.bf16.msra.mxu0 %v642_v1  ;;  %v648_v5 = vld [vmem:[#allocation2 + $0x20] ss:$8 sps:$4 sm:$0xff]   ;;  %v649_v6 = vld [vmem:[#allocation2 + $0x34] ss:$8 sps:$4 sm:$0xff]   ;;  %v651_v7 = vld [vmem:[#allocation2 + $0x30] ss:$8 sps:$4 sm:$0xff]  }
  0x28   :  { %266 = vmatprep.subr.bf16.mxu0 %v643_v2  ;;  %v652_v8 = vld [vmem:[#allocation2 + $0x44] ss:$8 sps:$4 sm:$0xff]   ;;  %v654_v9 = vld [vmem:[#allocation2 + $0x40] ss:$8 sps:$4 sm:$0xff]   ;;  %v655_v10 = vld [vmem:[#allocation2 + $0x54] ss:$8 sps:$4 sm:$0xff]   ;;  %v84_v2 = vlaneseq }
  0x29   :  { %v657_v11 = vld [vmem:[#allocation2 + $0x50] ss:$8 sps:$4 sm:$0xff]   ;;  %v658_v12 = vld [vmem:[#allocation2 + $0x64] ss:$8 sps:$4 sm:$0xff]   ;;  %v660_v13 = vld [vmem:[#allocation2 + $0x60] ss:$8 sps:$4 sm:$0xff]  }
  0x2a   :  { %v661_v14 = vld [vmem:[#allocation2 + $0x74] ss:$8 sps:$4 sm:$0xff]   ;;  %v690_v15 = vld [vmem:[%s869_s0 + $0x4] ss:$8 sps:$4 sm:$0xff]   ;;  %v693_v17 = vld [vmem:[#allocation4] ss:$8 sps:$4 sm:$0xff]  }
  0x2b   :  { %267 = vmatpush1.bf16.msra.mxu0 %v645_v3  ;;  %v691_v16 = vld [vmem:[#allocation4 + $0x4] ss:$8 sps:$4 sm:$0xff]   ;;  %296 = vmatprep.mubr.bf16.mxu0 %v690_v15  ;;  %v694_v18 = vld [vmem:[#allocation4 + $0x14] ss:$8 sps:$4 sm:$0xff]   ;;  %v696_v19 = vld [vmem:[#allocation4 + $0x10] ss:$8 sps:$4 sm:$0xff]  }
  0x2c   :  { %268 = vmatprep.subr.bf16.mxu0 %v646_v4  ;;  %517 = vmatprep.subr.bf16.mxu1 %v691_v16  ;;  %v663_v20 = vld [vmem:[#allocation2 + $0x70] ss:$8 sps:$4 sm:$0xff]   ;;  %v697_v21 = vld [vmem:[#allocation4 + $0x24] ss:$8 sps:$4 sm:$0xff]   ;;  %v699_v23 = vld [vmem:[#allocation4 + $0x20] ss:$8 sps:$4 sm:$0xff]  }
  0x2d   :  { %518 = vmatpush1.bf16.msra.mxu1 %v693_v17  ;;  %v664_v22 = vld [vmem:[#allocation2 + $0x84] ss:$8 sps:$4 sm:$0xff]   ;;  %v666_v24 = vld [vmem:[#allocation2 + $0x80] ss:$8 sps:$4 sm:$0xff]   ;;  %v700_v25 = vld [vmem:[#allocation4 + $0x34] ss:$8 sps:$4 sm:$0xff]  }
  0x2e   :  { %519 = vmatprep.subr.bf16.mxu1 %v694_v18  ;;  %v667_v26 = vld [vmem:[#allocation2 + $0x94] ss:$8 sps:$4 sm:$0xff]   ;;  %v702_v27 = vld [vmem:[#allocation4 + $0x30] ss:$8 sps:$4 sm:$0xff]   ;;  %v703_v29 = vld [vmem:[#allocation4 + $0x44] ss:$8 sps:$4 sm:$0xff]  }
  0x2f   :  { %269 = vmatpush1.bf16.msra.mxu0 %v648_v5  ;;  %v669_v28 = vld [vmem:[#allocation2 + $0x90] ss:$8 sps:$4 sm:$0xff]   ;;  %v670_v30 = vld [vmem:[#allocation2 + $0xa4] ss:$8 sps:$4 sm:$0xff]   ;;  %v705_v31 = vld [vmem:[#allocation4 + $0x40] ss:$8 sps:$4 sm:$0xff]  }
  0x30   :  { %270 = vmatprep.subr.bf16.mxu0 %v649_v6  ;;  %v672_v32 = vld [vmem:[#allocation2 + $0xa0] ss:$8 sps:$4 sm:$0xff]   ;;  %v706_v33 = vld [vmem:[#allocation4 + $0x54] ss:$8 sps:$4 sm:$0xff]   ;;  %v708_v35 = vld [vmem:[#allocation4 + $0x50] ss:$8 sps:$4 sm:$0xff]  }
  0x31   :  { %520 = vmatpush1.bf16.msra.mxu1 %v696_v19  ;;  %v673_v34 = vld [vmem:[#allocation2 + $0xb4] ss:$8 sps:$4 sm:$0xff]   ;;  %v675_v36 = vld [vmem:[#allocation2 + $0xb0] ss:$8 sps:$4 sm:$0xff]   ;;  %v709_v37 = vld [vmem:[#allocation4 + $0x64] ss:$8 sps:$4 sm:$0xff]  }
  0x32   :  { %521 = vmatprep.subr.bf16.mxu1 %v697_v21  ;;  %v676_v38 = vld [vmem:[#allocation2 + $0xc4] ss:$8 sps:$4 sm:$0xff]   ;;  %v711_v39 = vld [vmem:[#allocation4 + $0x60] ss:$8 sps:$4 sm:$0xff]   ;;  %v712_v41 = vld [vmem:[#allocation4 + $0x74] ss:$8 sps:$4 sm:$0xff]  }
  0x33   :  { %271 = vmatpush1.bf16.msra.mxu0 %v651_v7  ;;  %v678_v40 = vld [vmem:[#allocation2 + $0xc0] ss:$8 sps:$4 sm:$0xff]   ;;  %v679_v42 = vld [vmem:[#allocation2 + $0xd4] ss:$8 sps:$4 sm:$0xff]   ;;  %v714_v43 = vld [vmem:[#allocation4 + $0x70] ss:$8 sps:$4 sm:$0xff]  }
  0x34   :  { %272 = vmatprep.subr.bf16.mxu0 %v652_v8  ;;  %v681_v44 = vld [vmem:[#allocation2 + $0xd0] ss:$8 sps:$4 sm:$0xff]   ;;  %v715_v45 = vld [vmem:[#allocation4 + $0x84] ss:$8 sps:$4 sm:$0xff]   ;;  %v717_v47 = vld [vmem:[#allocation4 + $0x80] ss:$8 sps:$4 sm:$0xff]  }
  0x35   :  { %522 = vmatpush1.bf16.msra.mxu1 %v699_v23  ;;  %v682_v46 = vld [vmem:[#allocation2 + $0xe4] ss:$8 sps:$4 sm:$0xff]   ;;  %v684_v48 = vld [vmem:[#allocation2 + $0xe0] ss:$8 sps:$4 sm:$0xff]   ;;  %v718_v49 = vld [vmem:[#allocation4 + $0x94] ss:$8 sps:$4 sm:$0xff]  }
  0x36   :  { %523 = vmatprep.subr.bf16.mxu1 %v700_v25  ;;  %v685_v50 = vld [vmem:[#allocation2 + $0xf4] ss:$8 sps:$4 sm:$0xff]   ;;  %v720_v51 = vld [vmem:[#allocation4 + $0x90] ss:$8 sps:$4 sm:$0xff]   ;;  %v721_v53 = vld [vmem:[#allocation4 + $0xa4] ss:$8 sps:$4 sm:$0xff]  }
  0x37   :  { %273 = vmatpush1.bf16.msra.mxu0 %v654_v9  ;;  %v687_v52 = vld [vmem:[#allocation2 + $0xf0] ss:$8 sps:$4 sm:$0xff]   ;;  %v688_v54 = vld [vmem:[%s869_s0] ss:$8 sps:$4 sm:$0xff]   ;;  %v724_v56 = vld [vmem:[#allocation4 + $0xb4] ss:$8 sps:$4 sm:$0xff]  }
  0x38   :  { %274 = vmatprep.subr.bf16.mxu0 %v655_v10  ;;  %v723_v55 = vld [vmem:[#allocation4 + $0xa0] ss:$8 sps:$4 sm:$0xff]   ;;  %v726_v57 = vld [vmem:[#allocation4 + $0xb0] ss:$8 sps:$4 sm:$0xff]   ;;  %v727_v58 = vld [vmem:[#allocation4 + $0xc4] ss:$8 sps:$4 sm:$0xff]  }
  0x39   :  { %524 = vmatpush1.bf16.msra.mxu1 %v702_v27  ;;  %v729_v59 = vld [vmem:[#allocation4 + $0xc0] ss:$8 sps:$4 sm:$0xff]   ;;  %v730_v60 = vld [vmem:[#allocation4 + $0xd4] ss:$8 sps:$4 sm:$0xff]   ;;  %v732_v61 = vld [vmem:[#allocation4 + $0xd0] ss:$8 sps:$4 sm:$0xff]  }
  0x3a   :  { %525 = vmatprep.subr.bf16.mxu1 %v703_v29  ;;  %v733_v62 = vld [vmem:[#allocation4 + $0xe4] ss:$8 sps:$4 sm:$0xff]   ;;  %v735_v63 = vld [vmem:[#allocation4 + $0xe0] ss:$8 sps:$4 sm:$0xff]   ;;  %v736_v0 = vld [vmem:[#allocation4 + $0xf4] ss:$8 sps:$4 sm:$0xff]  }
  0x3b   :  { %275 = vmatpush1.bf16.msra.mxu0 %v657_v11  ;;  %v738_v1 = vld [vmem:[#allocation4 + $0xf0] ss:$8 sps:$4 sm:$0xff]   ;;  %v85_v3 = vshrl.u32 %v84_v2, 7  ;;  %v82_v5 = vld [vmem:[%s871_s2] sm:$0x3] }
  0x3c   :  { %276 = vmatprep.subr.bf16.mxu0 %v658_v12  ;;  %v345_v23 = vld [vmem:[%s873_s4] sm:$0x3] }
  0x3d   :  { %526 = vmatpush1.bf16.msra.mxu1 %v705_v31  ;;  %v86_v4 = vsub.s32 0, %v85_v3  ;;  %v90_v6 = vsub.s32 1, %v85_v3 }
  0x3e   :  { %527 = vmatprep.subr.bf16.mxu1 %v706_v33 }
  0x3f   :  { %277 = vmatpush1.bf16.msra.mxu0 %v660_v13  ;;  %v87_v7 = vrot.slane %v82_v5, %v86_v4  ;;  %v91_v8 = vrot.slane %v82_v5, %v90_v6  ;;  %v354_v25 = vrot.slane %v345_v23, %v90_v6 }
  0x40   :  { %278 = vmatprep.subr.bf16.mxu0 %v661_v14 }
  0x41   :  { %528 = vmatpush1.bf16.msra.mxu1 %v708_v35 }
  0x42   :  { %529 = vmatprep.subr.bf16.mxu1 %v709_v37 }
  0x43   :  { %279 = vmatpush1.bf16.msra.mxu0 %v663_v20 }
  0x44   :  { %280 = vmatprep.subr.bf16.mxu0 %v664_v22 }
  0x45   :  { %530 = vmatpush1.bf16.msra.mxu1 %v711_v39 }
  0x46   :  { %531 = vmatprep.subr.bf16.mxu1 %v712_v41 }
  0x47   :  { %281 = vmatpush1.bf16.msra.mxu0 %v666_v24  ;;  %v350_v24 = vrot.slane %v345_v23, %v86_v4 }
  0x48   :  { %282 = vmatprep.subr.bf16.mxu0 %v667_v26 }
  0x49   :  { %532 = vmatpush1.bf16.msra.mxu1 %v714_v43 }
  0x4a   :  { %533 = vmatprep.subr.bf16.mxu1 %v715_v45 }
  0x4b   :  { %283 = vmatpush1.bf16.msra.mxu0 %v669_v28 }
  0x4c   :  { %284 = vmatprep.subr.bf16.mxu0 %v670_v30 }
  0x4d   :  { %534 = vmatpush1.bf16.msra.mxu1 %v717_v47 }
  0x4e   :  { %535 = vmatprep.subr.bf16.mxu1 %v718_v49 }
  0x4f   :  { %285 = vmatpush1.bf16.msra.mxu0 %v672_v32 }
  0x50   :  { %286 = vmatprep.subr.bf16.mxu0 %v673_v34 }
  0x51   :  { %536 = vmatpush1.bf16.msra.mxu1 %v720_v51 }
  0x52   :  { %537 = vmatprep.subr.bf16.mxu1 %v721_v53 }
  0x53   :  { %287 = vmatpush1.bf16.msra.mxu0 %v675_v36 }
  0x54   :  { %288 = vmatprep.subr.bf16.mxu0 %v676_v38 }
  0x55   :  { %538 = vmatpush1.bf16.msra.mxu1 %v723_v55 }
  0x56   :  { %539 = vmatprep.subr.bf16.mxu1 %v724_v56 }
  0x57   :  { %289 = vmatpush1.bf16.msra.mxu0 %v678_v40 }
  0x58   :  { %290 = vmatprep.subr.bf16.mxu0 %v679_v42 }
  0x59   :  { %540 = vmatpush1.bf16.msra.mxu1 %v726_v57 }
  0x5a   :  { %541 = vmatprep.subr.bf16.mxu1 %v727_v58 }
  0x5b   :  { %291 = vmatpush1.bf16.msra.mxu0 %v681_v44 }
  0x5c   :  { %292 = vmatprep.subr.bf16.mxu0 %v682_v46 }
  0x5d   :  { %542 = vmatpush1.bf16.msra.mxu1 %v729_v59 }
  0x5e   :  { %543 = vmatprep.subr.bf16.mxu1 %v730_v60 }
  0x5f   :  { %293 = vmatpush1.bf16.msra.mxu0 %v684_v48 }
  0x60   :  { %294 = vmatprep.subr.bf16.mxu0 %v685_v50 }
  0x61   :  { %544 = vmatpush1.bf16.msra.mxu1 %v732_v61 }
  0x62   :  { %545 = vmatprep.subr.bf16.mxu1 %v733_v62 }
  0x63   :  { %295 = vmatpush1.bf16.msra.mxu0 %v687_v52 }
  0x65   :  { %546 = vmatpush1.bf16.msra.mxu1 %v735_v63 }
  0x66   :  { %297 = vmatmul.mubr.bf16.vlgmr.msra.gmra.mrb[0].mxu0 %v688_v54  ;;  %547 = vmatprep.subr.bf16.mxu1 %v736_v0 }
  0x69   :  { %548 = vmatpush1.bf16.msra.mxu1 %v738_v1 }
 0x139   :  { %v298_v9 = vpop.f32.mrb[0].mxu0 }
 0x13a   :  { %v299_v10 = vadd.f32 %v298_v9, %v87_v7  ;;  %v300_v11 = vpop.f32.mrb[1].mxu0 }
 0x13b   :  { %v301_v12 = vadd.f32 %v300_v11, %v91_v8  ;;  %v302_v13 = vpop.f32.mrb[2].mxu0 }
 0x13c   :  { %v303_v14 = vadd.f32 %v302_v13, %v87_v7  ;;  %v304_v15 = vpop.f32.mrb[3].mxu0  ;;  %v307_v17 = vmax.f32 %v299_v10, 0.0 }
 0x13d   :  { %v305_v16 = vadd.f32 %v304_v15, %v91_v8  ;;  %v308_v19 = vmax.f32 %v301_v12, 0.0 }
 0x13e   :  { %v309_v18 = vmax.f32 %v303_v14, 0.0 }
 0x13f   :  { %v310_v20 = vmax.f32 %v305_v16, 0.0 }
 0x140   :  { %v311_v21 = vpack.c.bf16 %v309_v18, %v307_v17 }
 0x141   :  { %v312_v22 = vpack.c.bf16 %v310_v20, %v308_v19 }
 0x143   :  { %549 = vmatprep.mubr.bf16.mxu1 %v312_v22 }
 0x144   :  { %550 = vmatmul.mubr.bf16.vlgmr.msra.gmra.mrb[0].mxu1 %v311_v21 }
 0x217   :  { %v551_v26 = vpop.f32.mrb[0].mxu1 }
 0x218   :  { %v552_v27 = vadd.f32 %v551_v26, %v350_v24  ;;  %v553_v28 = vpop.f32.mrb[1].mxu1 }
 0x219   :  { %v554_v29 = vadd.f32 %v553_v28, %v354_v25  ;;  %v555_v30 = vpop.f32.mrb[2].mxu1 }
 0x21a   :  { %560 = vst [vmem:[%s874_s5] sm:$0xff] %v552_v27  ;;  %v556_v31 = vadd.f32 %v555_v30, %v350_v24  ;;  %v557_v32 = vpop.f32.mrb[3].mxu1 }
 0x21b   :  { %561 = vst [vmem:[%s874_s5 + $0x8] sm:$0xff] %v554_v29  ;;  %v558_v33 = vadd.f32 %v557_v32, %v354_v25 }
 0x21c   :  { %562 = vst [vmem:[%s874_s5 + $0x10] sm:$0xff] %v556_v31 }
 0x21d   :  { %563 = vst [vmem:[%s874_s5 + $0x18] sm:$0xff] %v558_v33 }
 0x21e   :  { %568 = vsyncpa [#allocation3], 1 }
 0x21f   :  { %569 = vsyncpa [#allocation5], 1 }

</bundles_post_ra>
